<compile_context>
chip_gen: v5e
topology: v5e:2x2
jax: 0.10.0
libtpu: 0.0.40
codegen_flags: <defaults>
</compile_context>

<pallas_src>
import functools

import numpy as np

import jax
import jax.numpy as jnp
from jax import lax
from jax.experimental import pallas as pl
from jax.experimental.pallas import tpu as pltpu


# ----------------------------- Pallas kernel --------------------------------
def basic_blocks_kernel(x_ref, t_ref, b_ref, o_ref, *, H, nblk):
    """Chain of `nblk` fused BasicBlocks on one lane-dense batch slab.

    x_ref : (R, W*C)                rows = (image, h), lanes = (w, c)  -- lane dense
    t_ref : (nblk, 2, 3*W*C, W*Co)  stacked width-Toeplitz conv matrices
                                    (BN scale folded in; contraction index = (kh, w, ci))
    b_ref : (nblk, 2, 1, W*Co)      BN bias tiled over w
    o_ref : (R, W*Co)
    """
    R, WC = x_ref.shape
    x = x_ref[...]

    # Per-image row index (0..H-1).  The masks encode the height zero-padding and
    # prevent leakage between the images stacked in this slab.
    row = lax.broadcasted_iota(jnp.int32, (R, WC), 0) % H
    not_top = row != 0            # row h-1 does not exist at the top of an image
    not_bot = row != (H - 1)      # row h+1 does not exist at the bottom of an image

    def conv3x3(a, t):
        # h-1 / h+1 rows via XLU sublane rotation + VPU mask (no MXU work).
        a_up = jnp.where(not_top, pltpu.roll(a, 1, 0), 0.0)      # a_up[r] = a[r-1]
        a_dn = jnp.where(not_bot, pltpu.roll(a, R - 1, 0), 0.0)  # a_dn[r] = a[r+1]
        # Single fat matmul: K = 3*W*C = 384 fills the MXU contraction depth.
        a3 = jnp.concatenate([a_up, a, a_dn], axis=1)            # (R, 3*W*C)
        return jnp.dot(a3, t, preferred_element_type=jnp.float32)

    for blk in range(nblk):  # static unroll: all blocks fused in one pallas_call
        # conv1 + bn1 + relu
        y = jnp.maximum(conv3x3(x, t_ref[blk, 0]) + b_ref[blk, 0], 0.0)
        # conv2 + bn2 + residual + relu
        x = jnp.maximum(conv3x3(y, t_ref[blk, 1]) + b_ref[blk, 1] + x, 0.0)

    o_ref[...] = x.astype(o_ref.dtype)  # lane-dense, unmasked full-lane store


# ----------------------------- host-side constant builders -------------------
def _toeplitz_stack(w_hwio, scale, W):
    """(3,3,Ci,Co) HWIO weights -> (3*W*Ci, W*Co) width-Toeplitz matmul matrix.

    T[(kh*W+ws)*Ci+ci, wd*Co+co] = w[kh, ws-wd+1, ci, co] * scale[co] if |ws-wd|<=1 else 0.
    The banded structure encodes the width zero-padding for free; the kh-major stacking
    matches the [a_up | a | a_dn] lane concatenation inside the kernel.
    """
    KH, KW, Ci, Co = w_hwio.shape
    ws = np.arange(W)[:, None]            # source w (row block of T)
    wd = np.arange(W)[None, :]            # dest   w (col block of T)
    kw = ws - wd + 1                      # which width tap maps ws -> wd
    valid = (kw >= 0) & (kw < KW)
    kw_c = np.clip(kw, 0, KW - 1)

    w_scaled = w_hwio * scale[None, None, None, :]        # fold BN scale into weights
    taps = w_scaled[:, kw_c]                              # (KH, W, W, Ci, Co)
    taps = jnp.where(valid[None, :, :, None, None], taps, 0.0)
    t = jnp.transpose(taps, (0, 1, 3, 2, 4)).reshape(KH, W * Ci, W * Co)
    return t.reshape(KH * W * Ci, W * Co)                 # (3*W*Ci, W*Co)


def _fold_block(params, W, eps):
    """Fold eval-mode BN into the two conv Toeplitz matrices + lane-tiled biases."""
    (w1, g1, be1, m1, v1, w2, g2, be2, m2, v2) = params
    Co = w1.shape[0]
    s1 = (g1 / jnp.sqrt(v1 + eps)).astype(jnp.float32)
    s2 = (g2 / jnp.sqrt(v2 + eps)).astype(jnp.float32)
    b1 = jnp.tile((be1 - m1 * s1).astype(jnp.float32), W).reshape(1, W * Co)
    b2 = jnp.tile((be2 - m2 * s2).astype(jnp.float32), W).reshape(1, W * Co)
    t1 = _toeplitz_stack(jnp.transpose(w1, (2, 3, 1, 0)).astype(jnp.float32), s1, W)
    t2 = _toeplitz_stack(jnp.transpose(w2, (2, 3, 1, 0)).astype(jnp.float32), s2, W)
    return jnp.stack([t1, t2]), jnp.stack([b1, b2])   # (2, 3WC, WCo), (2, 1, WCo)


def _parallel_steps(N):
    """2 'parallel' grid steps only on v7x (2 TensorCores/device); 1 on v5e/v6e."""
    try:
        kind = jax.devices()[0].device_kind.lower()
    except Exception:
        kind = ""
    two_cores = ("v7" in kind) or ("tpu7" in kind)
    return 2 if (two_cores and N % 2 == 0) else 1


# ----------------------------- lane-dense API ---------------------------------
def to_lane_dense(x_nchw):
    """NCHW -> (N*H, W*C) lane-dense 2D layout (do once per network, not per block)."""
    N, C, H, W = x_nchw.shape
    return jnp.transpose(x_nchw, (0, 2, 3, 1)).reshape(N * H, W * C).astype(jnp.float32)


def from_lane_dense(x2d, N, C, H, W):
    """(N*H, W*C) -> NCHW."""
    return jnp.transpose(x2d.reshape(N, H, W, C), (0, 3, 1, 2))


def basic_blocks_forward_2d(x2d, params_list, *, H, eps=1e-5):
    """Fused chain of BasicBlocks (one pallas_call) on a lane-dense activation slab."""
    NH, WC = x2d.shape
    N = NH // H
    nblk = len(params_list)
    Ci = params_list[0][0].shape[1]
    Co = params_list[0][0].shape[0]
    W = WC // Ci
    assert Co == Ci, "residual add requires Cin == Cout (no downsample path)"

    folded = [_fold_block(p, W, eps) for p in params_list]
    t_all = jnp.stack([t for t, _ in folded])   # (nblk, 2, 3*W*Ci, W*Co)
    b_all = jnp.stack([b for _, b in folded])   # (nblk, 2, 1, W*Co)

    # v7x: one half-batch slab per TensorCore.  v5e/v6e: one big slab (no extra per-step
    # overhead, full M rows on the MXU).  If the batch grows, retile R toward the native
    # MXU M (256 on v6e/v7x, 128 on v5e).
    steps = _parallel_steps(N)
    nb = N // steps
    R = nb * H
    WCo = W * Co

    kernel = functools.partial(basic_blocks_kernel, H=H, nblk=nblk)
    return pl.pallas_call(
        kernel,
        out_shape=jax.ShapeDtypeStruct((NH, WCo), jnp.float32),
        grid_spec=pltpu.PrefetchScalarGridSpec(
            num_scalar_prefetch=0,
            grid=(steps,),
            in_specs=[
                pl.BlockSpec((R, WC), lambda i: (i, 0)),                       # x slab
                pl.BlockSpec((nblk, 2, 3 * WC, WCo), lambda i: (0, 0, 0, 0)),  # Toeplitz
                pl.BlockSpec((nblk, 2, 1, WCo), lambda i: (0, 0, 0, 0)),       # biases
            ],
            out_specs=pl.BlockSpec((R, WCo), lambda i: (i, 0)),
        ),
        compiler_params=pltpu.CompilerParams(
            dimension_semantics=("parallel",),
            vmem_limit_bytes=32 * 1024 * 1024,
        ),
    )(x2d, t_all, b_all)


def basic_block_forward(x_nchw, params, eps=1e-5):
    """Single BasicBlock, NCHW in / NCHW out (layout change happens once here)."""
    N, C, H, W = x_nchw.shape
    # NOTE: the reference computes `out = tsm(x)` and discards it; omitted (dead code).
    x2d = to_lane_dense(x_nchw)
    out2d = basic_blocks_forward_2d(x2d, [params], H=H, eps=eps)
    return from_lane_dense(out2d, N, C, H, W)


# ----------------------------- reference (plain JAX) --------------------------
def reference_forward(x, params, eps=1e-5):
    (w1, g1, be1, m1, v1, w2, g2, be2, m2, v2) = params

    def conv(a, w):
        return lax.conv_general_dilated(
            a, w, window_strides=(1, 1), padding=((1, 1), (1, 1)),
            dimension_numbers=("NCHW", "OIHW", "NCHW"))

    def bn(a, g, b, m, v):
        return (a - m[None, :, None, None]) / jnp.sqrt(v[None, :, None, None] + eps) \
            * g[None, :, None, None] + b[None, :, None, None]

    out = jnp.maximum(bn(conv(x, w1), g1, be1, m1, v1), 0.0)
    out = bn(conv(out, w2), g2, be2, m2, v2)
    return jnp.maximum(out + x, 0.0)


# ----------------------------- main -------------------------------------------
if __name__ == "__main__":
    # inplanes = planes = 8, stride = 1, downsample = None.
    # N divisible by num_segments (=3) per the TSM view; C divisible by 4; W*C = 128.
    N, C, H, W = 6, 8, 16, 16
    planes = C

    key = jax.random.PRNGKey(0)
    ks = jax.random.split(key, 21)
    x = jax.random.normal(ks[0], (N, C, H, W), jnp.float32)

    def make_params(k0):
        kk = jax.random.split(k0, 10)
        w1 = jax.random.normal(kk[0], (planes, C, 3, 3), jnp.float32) * 0.1
        g1 = jax.random.uniform(kk[1], (planes,), jnp.float32, 0.5, 1.5)
        be1 = jax.random.normal(kk[2], (planes,), jnp.float32) * 0.1
        m1 = jax.random.normal(kk[3], (planes,), jnp.float32) * 0.1
        v1 = jax.random.uniform(kk[4], (planes,), jnp.float32, 0.5, 1.5)
        w2 = jax.random.normal(kk[5], (planes, planes, 3, 3), jnp.float32) * 0.1
        g2 = jax.random.uniform(kk[6], (planes,), jnp.float32, 0.5, 1.5)
        be2 = jax.random.normal(kk[7], (planes,), jnp.float32) * 0.1
        m2 = jax.random.normal(kk[8], (planes,), jnp.float32) * 0.1
        v2 = jax.random.uniform(kk[9], (planes,), jnp.float32, 0.5, 1.5)
        return (w1, g1, be1, m1, v1, w2, g2, be2, m2, v2)

    params_a = make_params(ks[1])
    params_b = make_params(ks[2])

    # --- single BasicBlock (the module under test) ---
    fwd = jax.jit(lambda xx: basic_block_forward(xx, params_a))
    out = jax.block_until_ready(fwd(x))
    ref = jax.block_until_ready(reference_forward(x, params_a))
    assert out.shape == (N, C, H, W), out.shape
    np.testing.assert_allclose(np.asarray(out), np.asarray(ref), rtol=1e-4, atol=1e-4)

    # --- two chained BasicBlocks fused into ONE pallas_call, staying lane-dense ---
    def chain2(xx):
        x2d = to_lane_dense(xx)
        o2d = basic_blocks_forward_2d(x2d, [params_a, params_b], H=H)
        return from_lane_dense(o2d, N, C, H, W)

    out2 = jax.block_until_ready(jax.jit(chain2)(x))
    ref2 = jax.block_until_ready(
        reference_forward(reference_forward(x, params_a), params_b))
    np.testing.assert_allclose(np.asarray(out2), np.asarray(ref2), rtol=1e-4, atol=1e-4)

    print("KERNEL_OK")
</pallas_src>

<mosaic_0001>
module attributes {stable_mosaic.version = 11 : i64} {
  func.func @basic_blocks_kernel(%arg0: i32, %arg1: memref<96x128xf32, #tpu.memory_space<vmem>>, %arg2: memref<1x2x384x128xf32, #tpu.memory_space<vmem>>, %arg3: memref<1x2x1x128xf32, #tpu.memory_space<vmem>>, %arg4: memref<96x128xf32, #tpu.memory_space<vmem>>) attributes {dimension_semantics = [#tpu.dimension_semantics<parallel>], iteration_bounds = array<i64: 1>, scalar_prefetch = 0 : i64, scratch_operands = 0 : i64, tpu.core_type = #tpu.core_type<tc>, window_params = [{transform_indices = @transform_0, window_bounds = array<i64: 96, 128>}, {pipeline_mode = #tpu.pipeline_mode<synchronous>, transform_indices = @transform_1, window_bounds = array<i64: 1, 2, 384, 128>}, {pipeline_mode = #tpu.pipeline_mode<synchronous>, transform_indices = @transform_2, window_bounds = array<i64: 1, 2, 1, 128>}, {transform_indices = @transform_3, window_bounds = array<i64: 96, 128>}]} {
    %c0 = arith.constant 0 : index
    %c0_0 = arith.constant 0 : index
    %0 = vector.load %arg1[%c0, %c0_0] : memref<96x128xf32, #tpu.memory_space<vmem>>, vector<96x128xf32>
    %1 = tpu.iota {dimensions = array<i32: 0>} : vector<96x128xi32>
    %c16_i32 = arith.constant 16 : i32
    %c0_i32 = arith.constant 0 : i32
    %2 = arith.cmpi eq, %c16_i32, %c0_i32 : i32
    %c1_i32 = arith.constant 1 : i32
    %3 = arith.select %2, %c1_i32, %c16_i32 : i32
    %4 = vector.broadcast %3 : i32 to vector<96x128xi32>
    %5 = arith.remsi %1, %4 : vector<96x128xi32>
    %c0_i32_1 = arith.constant 0 : i32
    %6 = vector.broadcast %c0_i32_1 : i32 to vector<96x128xi32>
    %7 = arith.cmpi ne, %5, %6 : vector<96x128xi32>
    %c0_i32_2 = arith.constant 0 : i32
    %8 = vector.broadcast %c0_i32_2 : i32 to vector<96x128xi32>
    %9 = arith.cmpi slt, %5, %8 : vector<96x128xi32>
    %c0_i32_3 = arith.constant 0 : i32
    %10 = arith.cmpi slt, %3, %c0_i32_3 : i32
    %11 = vector.broadcast %10 : i1 to vector<96x128xi1>
    %12 = vector.broadcast %11 : vector<96x128xi1> to vector<96x128xi1>
    %13 = arith.xori %9, %12 : vector<96x128xi1>
    %14 = arith.andi %13, %7 : vector<96x128xi1>
    %15 = vector.broadcast %3 : i32 to vector<96x128xi32>
    %16 = arith.addi %5, %15 : vector<96x128xi32>
    %17 = arith.select %14, %16, %5 : vector<96x128xi1>, vector<96x128xi32>
    %c0_i32_4 = arith.constant 0 : i32
    %18 = vector.broadcast %c0_i32_4 : i32 to vector<96x128xi32>
    %19 = arith.cmpi ne, %17, %18 : vector<96x128xi32>
    %c15_i32 = arith.constant 15 : i32
    %20 = vector.broadcast %c15_i32 : i32 to vector<96x128xi32>
    %21 = arith.cmpi ne, %17, %20 : vector<96x128xi32>
    %c0_5 = arith.constant 0 : index
    %c0_6 = arith.constant 0 : index
    %c0_7 = arith.constant 0 : index
    %c0_8 = arith.constant 0 : index
    %22 = vector.load %arg2[%c0_5, %c0_6, %c0_7, %c0_8] : memref<1x2x384x128xf32, #tpu.memory_space<vmem>>, vector<1x1x384x128xf32>
    %23 = vector.shape_cast %22 : vector<1x1x384x128xf32> to vector<384x128xf32>
    %c1_i32_9 = arith.constant 1 : i32
    %24 = tpu.dynamic_rotate %0 by %c1_i32_9 dim 0 : vector<96x128xf32>, i32 -> vector<96x128xf32>
    %cst = arith.constant 0.000000e+00 : f32
    %25 = vector.broadcast %cst : f32 to vector<96x128xf32>
    %26 = arith.select %19, %24, %25 : vector<96x128xi1>, vector<96x128xf32>
    %c95_i32 = arith.constant 95 : i32
    %27 = tpu.dynamic_rotate %0 by %c95_i32 dim 0 : vector<96x128xf32>, i32 -> vector<96x128xf32>
    %cst_10 = arith.constant 0.000000e+00 : f32
    %28 = vector.broadcast %cst_10 : f32 to vector<96x128xf32>
    %29 = arith.select %21, %27, %28 : vector<96x128xi1>, vector<96x128xf32>
    %30 = tpu.concatenate %26, %0, %29 in 1 : vector<96x128xf32>, vector<96x128xf32>, vector<96x128xf32> -> vector<96x384xf32>
    %cst_11 = arith.constant dense<0.000000e+00> : vector<96x128xf32>
    %31 = tpu.matmul %30, %23, %cst_11 {dimension_numbers = #tpu.dot_dimension_numbers<[1], [0], [0], [1], [0, 0, 1, 1], [], []>} : vector<96x384xf32>, vector<384x128xf32>, vector<96x128xf32> -> vector<96x128xf32>
    %c0_12 = arith.constant 0 : index
    %c0_13 = arith.constant 0 : index
    %c0_14 = arith.constant 0 : index
    %c0_15 = arith.constant 0 : index
    %32 = vector.load %arg3[%c0_12, %c0_13, %c0_14, %c0_15] : memref<1x2x1x128xf32, #tpu.memory_space<vmem>>, vector<1x1x1x128xf32>
    %33 = vector.shape_cast %32 : vector<1x1x1x128xf32> to vector<1x128xf32>
    %34 = vector.broadcast %33 : vector<1x128xf32> to vector<96x128xf32>
    %35 = arith.addf %31, %34 : vector<96x128xf32>
    %cst_16 = arith.constant 0.000000e+00 : f32
    %36 = vector.broadcast %cst_16 : f32 to vector<96x128xf32>
    %37 = arith.maximumf %35, %36 : vector<96x128xf32>
    %c0_17 = arith.constant 0 : index
    %c1 = arith.constant 1 : index
    %c0_18 = arith.constant 0 : index
    %c0_19 = arith.constant 0 : index
    %38 = vector.load %arg2[%c0_17, %c1, %c0_18, %c0_19] : memref<1x2x384x128xf32, #tpu.memory_space<vmem>>, vector<1x1x384x128xf32>
    %39 = vector.shape_cast %38 : vector<1x1x384x128xf32> to vector<384x128xf32>
    %c1_i32_20 = arith.constant 1 : i32
    %40 = tpu.dynamic_rotate %37 by %c1_i32_20 dim 0 : vector<96x128xf32>, i32 -> vector<96x128xf32>
    %cst_21 = arith.constant 0.000000e+00 : f32
    %41 = vector.broadcast %cst_21 : f32 to vector<96x128xf32>
    %42 = arith.select %19, %40, %41 : vector<96x128xi1>, vector<96x128xf32>
    %c95_i32_22 = arith.constant 95 : i32
    %43 = tpu.dynamic_rotate %37 by %c95_i32_22 dim 0 : vector<96x128xf32>, i32 -> vector<96x128xf32>
    %cst_23 = arith.constant 0.000000e+00 : f32
    %44 = vector.broadcast %cst_23 : f32 to vector<96x128xf32>
    %45 = arith.select %21, %43, %44 : vector<96x128xi1>, vector<96x128xf32>
    %46 = tpu.concatenate %42, %37, %45 in 1 : vector<96x128xf32>, vector<96x128xf32>, vector<96x128xf32> -> vector<96x384xf32>
    %cst_24 = arith.constant dense<0.000000e+00> : vector<96x128xf32>
    %47 = tpu.matmul %46, %39, %cst_24 {dimension_numbers = #tpu.dot_dimension_numbers<[1], [0], [0], [1], [0, 0, 1, 1], [], []>} : vector<96x384xf32>, vector<384x128xf32>, vector<96x128xf32> -> vector<96x128xf32>
    %c0_25 = arith.constant 0 : index
    %c1_26 = arith.constant 1 : index
    %c0_27 = arith.constant 0 : index
    %c0_28 = arith.constant 0 : index
    %48 = vector.load %arg3[%c0_25, %c1_26, %c0_27, %c0_28] : memref<1x2x1x128xf32, #tpu.memory_space<vmem>>, vector<1x1x1x128xf32>
    %49 = vector.shape_cast %48 : vector<1x1x1x128xf32> to vector<1x128xf32>
    %50 = vector.broadcast %49 : vector<1x128xf32> to vector<96x128xf32>
    %51 = arith.addf %47, %50 : vector<96x128xf32>
    %52 = arith.addf %51, %0 : vector<96x128xf32>
    %cst_29 = arith.constant 0.000000e+00 : f32
    %53 = vector.broadcast %cst_29 : f32 to vector<96x128xf32>
    %54 = arith.maximumf %52, %53 : vector<96x128xf32>
    %c0_30 = arith.constant 0 : index
    %c0_31 = arith.constant 0 : index
    %55 = vector.load %arg4[%c0_30, %c0_31] : memref<96x128xf32, #tpu.memory_space<vmem>>, vector<96x128xf32>
    tpu.vector_store %arg4[%c0_30, %c0_31], %54 {strides = array<i32>} : memref<96x128xf32, #tpu.memory_space<vmem>>, vector<96x128xf32>,
    return
  }
  func.func @transform_0(%arg0: i32) -> (i32, i32) {
    %c0_i32 = arith.constant 0 : i32
    %c0_i32_0 = arith.constant 0 : i32
    return %arg0, %c0_i32 : i32, i32
  }
  func.func @transform_1(%arg0: i32) -> (i32, i32, i32, i32) {
    %c0_i32 = arith.constant 0 : i32
    %c0_i32_0 = arith.constant 0 : i32
    %c0_i32_1 = arith.constant 0 : i32
    %c0_i32_2 = arith.constant 0 : i32
    %c0_i32_3 = arith.constant 0 : i32
    return %c0_i32, %c0_i32_0, %c0_i32_1, %c0_i32_2 : i32, i32, i32, i32
  }
  func.func @transform_2(%arg0: i32) -> (i32, i32, i32, i32) {
    %c0_i32 = arith.constant 0 : i32
    %c0_i32_0 = arith.constant 0 : i32
    %c0_i32_1 = arith.constant 0 : i32
    %c0_i32_2 = arith.constant 0 : i32
    %c0_i32_3 = arith.constant 0 : i32
    return %c0_i32, %c0_i32_0, %c0_i32_1, %c0_i32_2 : i32, i32, i32, i32
  }
  func.func @transform_3(%arg0: i32) -> (i32, i32) {
    %c0_i32 = arith.constant 0 : i32
    %c0_i32_0 = arith.constant 0 : i32
    return %arg0, %c0_i32 : i32, i32
  }
}

</mosaic_0001>

<bundles_post_ra>
// kernel: tile.10
= control target key start
LH: loop header
LB: loop body
LE: loop exit
PB: predicated region body
PF: predicated region fallthrough
CT: control target
= control target key end

     0   :  { %s28_s0 = inlined_call_operand.vmem [shape: f32[8], index: 0, kind: input, shape index: {}]   ;;  %s29_s1 = inlined_call_operand.vmem [shape: f32[16,8], index: 1, kind: output, shape index: {}]  }
   0x1   :  { %v4_v0 = vld [vmem:[%s28_s0] ss:$0 sm:$0xff] }
   0x2   :  { %5 = vst [vmem:[%s29_s1] sm:$0xff] %v4_v0 }
   0x3   :  { %8 = vst [vmem:[%s29_s1 + $0x8] sm:$0xff] %v4_v0 }

// kernel: tile.14
= control target key start
LH: loop header
LB: loop body
LE: loop exit
PB: predicated region body
PF: predicated region fallthrough
CT: control target
= control target key end

     0   :  { %s131_s10 = smov 120   ;;  %s132_s11 = smov 104   ;;  %vm3_vm0 = vcmask 64512   ;;  %vm9_vm1 = vcmask 1048512   ;;  %vm15_vm2 = vcmask 982912   ;;  %vm21_vm3 = vcmask 917312   ;;  %s207_s0 = inlined_call_operand.vmem [shape: f32[16,8], index: 0, kind: input, shape index: {}]   ;;  %s208_s1 = inlined_call_operand.vmem [shape: f32[1,1,128], index: 1, kind: output, shape index: {}]  }
   0x1   :  { %v101_v0 = vld [vmem:[%s207_s0 + $0xf] sm:$0x1]   ;;  %v103_v1 = vld [vmem:[%s207_s0 + $0xd] sm:$0x1]   ;;  %v105_v2 = vld [vmem:[%s207_s0 + $0xb] sm:$0x1]  }
   0x2   :  { %7 = vrot.lane.b32.xlu0 %v101_v0, %s131_s10  ;;  %19 = vrot.lane.b32.xlu1 %v103_v1, %s132_s11  ;;  %s133_s14 = smov 88   ;;  %v102_v3 = vld [vmem:[%s207_s0 + $0xe] sm:$0x1]   ;;  %v104_v4 = vld [vmem:[%s207_s0 + $0xc] sm:$0x1]   ;;  %s134_s19 = smov 112  }
   0x3   :  { %31 = vrot.lane.b32.xlu2 %v105_v2, %s133_s14  ;;  %s135_s20 = smov 96   ;;  %v106_v5 = vld [vmem:[%s207_s0 + $0xa] sm:$0x1]   ;;  %s136_s23 = smov 80   ;;  %v107_v6 = vld [vmem:[%s207_s0 + $0x9] sm:$0x1]  }
   0x4   :  { %v108_v7 = vld [vmem:[%s207_s0 + $0x8] sm:$0x1]   ;;  %s137_s28 = smov 72   ;;  %s138_s29 = smov 64   ;;  %v109_v8 = vld [vmem:[%s207_s0 + $0x7] sm:$0x1]  }
   0x5   :  { %s139_s3 = smov 56   ;;  %v110_v9 = vld [vmem:[%s207_s0 + $0x6] sm:$0x1]   ;;  %v111_v10 = vld [vmem:[%s207_s0 + $0x5] sm:$0x1]   ;;  %s140_s8 = smov 48  }
   0x6   :  { %s141_s9 = smov 40   ;;  %v112_v11 = vld [vmem:[%s207_s0 + $0x4] sm:$0x1]   ;;  %s142_s12 = smov 32   ;;  %v113_v12 = vld [vmem:[%s207_s0 + $0x3] sm:$0x1]  }
   0x7   :  { %v114_v13 = vld [vmem:[%s207_s0 + $0x2] sm:$0x1]   ;;  %s143_s17 = smov 24   ;;  %s144_s18 = smov 16   ;;  %v115_v14 = vld [vmem:[%s207_s0 + $0x1] sm:$0x1]  }
   0x8   :  { %s145_s21 = smov 8   ;;  %v2_v15 = vld [vmem:[%s207_s0] sm:$0x1]   ;;  %vm27_vm4 = vcmask 851712   ;;  %vm33_vm5 = vcmask 786112   ;;  %vm39_vm6 = vcmask 720512  }
   0x9   :  { %4 = vst.msk [vmem:[#allocation0] sm:$0x1] %vm3_vm0, %v2_v15   ;;  %vm45_vm7 = vcmask 654912   ;;  %vm51_vm8 = vcmask 589312   ;;  %vm57_vm9 = vcmask 523712   ;;  %vm63_vm10 = vcmask 458112  }
   0xa   :  { %13 = vrot.lane.b32.xlu0 %v102_v3, %s134_s19  ;;  %25 = vrot.lane.b32.xlu1 %v104_v4, %s135_s20  ;;  %vm69_vm11 = vcmask 392512   ;;  %vm75_vm12 = vcmask 326912   ;;  %vm81_vm13 = vcmask 261312   ;;  %vm87_vm14 = vcmask 195712  }
   0xb   :  { %37 = vrot.lane.b32.xlu2 %v106_v5, %s136_s23  ;;  %vm93_vm15 = vcmask 130112  }
  0x12   :  { %43 = vrot.lane.b32.xlu0 %v107_v6, %s137_s28  ;;  %49 = vrot.lane.b32.xlu1 %v108_v7, %s138_s29 }
  0x13   :  { %55 = vrot.lane.b32.xlu2 %v109_v8, %s139_s3 }
  0x1a   :  { %61 = vrot.lane.b32.xlu0 %v110_v9, %s140_s8  ;;  %67 = vrot.lane.b32.xlu1 %v111_v10, %s141_s9 }
  0x1b   :  { %73 = vrot.lane.b32.xlu2 %v112_v11, %s142_s12 }
  0x22   :  { %79 = vrot.lane.b32.xlu0 %v113_v12, %s143_s17  ;;  %85 = vrot.lane.b32.xlu1 %v114_v13, %s144_s18 }
  0x23   :  { %91 = vrot.lane.b32.xlu2 %v115_v14, %s145_s21 }
  0x5d   :  { %v32_v16 = vpop.permute.xlu2 %31  }
  0x65   :  { %v38_v17 = vpop.permute.xlu2 %37  }
  0x6d   :  { %v56_v18 = vpop.permute.xlu2 %55  }
  0x74   :  { %v8_v19 = vpop.permute.xlu0 %7   ;;  %v20_v20 = vpop.permute.xlu1 %19  }
  0x75   :  { %10 = vst.msk [vmem:[#allocation0] sm:$0x1] %vm9_vm1, %v8_v19   ;;  %v74_v21 = vpop.permute.xlu2 %73  }
  0x7c   :  { %v14_v22 = vpop.permute.xlu0 %13   ;;  %v26_v23 = vpop.permute.xlu1 %25  }
  0x7d   :  { %16 = vst.msk [vmem:[#allocation0] sm:$0x1] %vm15_vm2, %v14_v22   ;;  %v92_v24 = vpop.permute.xlu2 %91  }
  0x7e   :  { %22 = vst.msk [vmem:[#allocation0] sm:$0x1] %vm21_vm3, %v20_v20  }
  0x7f   :  { %28 = vst.msk [vmem:[#allocation0] sm:$0x1] %vm27_vm4, %v26_v23  }
  0x80   :  { %34 = vst.msk [vmem:[#allocation0] sm:$0x1] %vm33_vm5, %v32_v16  }
  0x81   :  { %40 = vst.msk [vmem:[#allocation0] sm:$0x1] %vm39_vm6, %v38_v17  }
  0x84   :  { %v44_v25 = vpop.permute.xlu0 %43   ;;  %v50_v26 = vpop.permute.xlu1 %49  }
  0x85   :  { %46 = vst.msk [vmem:[#allocation0] sm:$0x1] %vm45_vm7, %v44_v25  }
  0x86   :  { %52 = vst.msk [vmem:[#allocation0] sm:$0x1] %vm51_vm8, %v50_v26  }
  0x87   :  { %58 = vst.msk [vmem:[#allocation0] sm:$0x1] %vm57_vm9, %v56_v18  }
  0x8c   :  { %v62_v27 = vpop.permute.xlu0 %61   ;;  %v68_v28 = vpop.permute.xlu1 %67  }
  0x8d   :  { %64 = vst.msk [vmem:[#allocation0] sm:$0x1] %vm63_vm10, %v62_v27  }
  0x8e   :  { %70 = vst.msk [vmem:[#allocation0] sm:$0x1] %vm69_vm11, %v68_v28  }
  0x8f   :  { %76 = vst.msk [vmem:[#allocation0] sm:$0x1] %vm75_vm12, %v74_v21  }
  0x94   :  { %v80_v29 = vpop.permute.xlu0 %79   ;;  %v86_v30 = vpop.permute.xlu1 %85  }
  0x95   :  { %82 = vst.msk [vmem:[#allocation0] sm:$0x1] %vm81_vm13, %v80_v29  }
  0x96   :  { %88 = vst.msk [vmem:[#allocation0] sm:$0x1] %vm87_vm14, %v86_v30  }
  0x97   :  { %94 = vst.msk [vmem:[#allocation0] sm:$0x1] %vm93_vm15, %v92_v24  }
  0x9e   :  { %v97_v31 = vld [vmem:[#allocation0] sm:$0x1] }
  0x9f   :  { %100 = vst [vmem:[%s208_s1] sm:$0x1] %v97_v31 }

// kernel: _lambda_.1
= control target key start
LH: loop header
LB: loop body
LE: loop exit
PB: predicated region body
PF: predicated region fallthrough
CT: control target
= control target key end

     0   :  { %v26_v16 = vlaneseq  ;;  %s1693_s1 = inlined_call_operand.vmem [shape: f32[1,2,384,128], index: 1, kind: input, shape index: {}]   ;;  %s1694_s0 = inlined_call_operand.vmem [shape: f32[96,128], index: 0, kind: input, shape index: {}]   ;;  %s1695_s2 = inlined_call_operand.vmem [shape: f32[1,2,1,128], index: 2, kind: input, shape index: {}]   ;;  %s1696_s3 = inlined_call_operand.vmem [shape: f32[96,128], index: 3, kind: output, shape index: {}]  }
   0x1   :  { %v222_v0 = vld [vmem:[%s1693_s1 + $0x78] sm:$0xff]  ;;  %v221_v1 = vld [vmem:[%s1693_s1 + $0x70] sm:$0xff]  ;;  %v220_v4 = vld [vmem:[%s1693_s1 + $0x68] sm:$0xff] }
   0x2   :  { %v238_v2 = vld [vmem:[%s1693_s1 + $0xf8] sm:$0xff]  ;;  %902 = vmatpush.msra.mxu2 %v222_v0  ;;  %v237_v3 = vld [vmem:[%s1693_s1 + $0xf0] sm:$0xff]  ;;  %v236_v5 = vld [vmem:[%s1693_s1 + $0xe8] sm:$0xff]  ;;  %333 = vmatpush.msra.mxu0 %v222_v0  ;;  %v1018_v21 = vshrl.u32 %v26_v16, 7 }
   0x3   :  { %918 = vmatpush.msra.mxu3 %v238_v2  ;;  %386 = vmatpush.msra.mxu1 %v238_v2  ;;  %v219_v6 = vld [vmem:[%s1693_s1 + $0x60] sm:$0xff]  ;;  %v218_v8 = vld [vmem:[%s1693_s1 + $0x58] sm:$0xff]  ;;  %v217_v10 = vld [vmem:[%s1693_s1 + $0x50] sm:$0xff] }
   0x4   :  { %903 = vmatpush.msra.mxu2 %v221_v1  ;;  %v235_v7 = vld [vmem:[%s1693_s1 + $0xe0] sm:$0xff]  ;;  %334 = vmatpush.msra.mxu0 %v221_v1  ;;  %v234_v9 = vld [vmem:[%s1693_s1 + $0xd8] sm:$0xff]  ;;  %v233_v11 = vld [vmem:[%s1693_s1 + $0xd0] sm:$0xff]  ;;  %v33_v27 = vadd.s32 48, %v1018_v21  ;;  %vm267_vm0 = vcmp.lt.s32.totalorder %v1018_v21, 1  ;;  %v35_v49 = vadd.s32 64, %v1018_v21 }
   0x5   :  { %919 = vmatpush.msra.mxu3 %v237_v3  ;;  %387 = vmatpush.msra.mxu1 %v237_v3  ;;  %v216_v12 = vld [vmem:[%s1693_s1 + $0x48] sm:$0xff]  ;;  %v215_v14 = vld [vmem:[%s1693_s1 + $0x40] sm:$0xff]  ;;  %v214_v17 = vld [vmem:[%s1693_s1 + $0x38] sm:$0xff]  ;;  %v43_v0 = vand.u32 15, %v1018_v21  ;;  %vm304_vm6 = vcmp.lt.s32.totalorder %v1018_v21, 7 }
   0x6   :  { %904 = vmatpush.msra.mxu2 %v220_v4  ;;  %335 = vmatpush.msra.mxu0 %v220_v4  ;;  %v232_v13 = vld [vmem:[%s1693_s1 + $0xc8] sm:$0xff]  ;;  %v231_v15 = vld [vmem:[%s1693_s1 + $0xc0] sm:$0xff]  ;;  %v230_v18 = vld [vmem:[%s1693_s1 + $0xb8] sm:$0xff]  ;;  %v85_v33 = vand.u32 15, %v33_v27  ;;  %v99_v54 = vand.u32 15, %v35_v49 }
   0x7   :  { %920 = vmatpush.msra.mxu3 %v236_v5  ;;  %388 = vmatpush.msra.mxu1 %v236_v5  ;;  %v213_v19 = vld [vmem:[%s1693_s1 + $0x30] sm:$0xff]  ;;  %v212_v22 = vld [vmem:[%s1693_s1 + $0x28] sm:$0xff]  ;;  %v211_v24 = vld [vmem:[%s1693_s1 + $0x20] sm:$0xff]  ;;  %vm1161_vm3 = vcmp.ne.s32.totalorder %v43_v0, 0 }
   0x8   :  { %905 = vmatpush.msra.mxu2 %v219_v6  ;;  %336 = vmatpush.msra.mxu0 %v219_v6  ;;  %v229_v20 = vld [vmem:[%s1693_s1 + $0xb0] sm:$0xff]  ;;  %v228_v23 = vld [vmem:[%s1693_s1 + $0xa8] sm:$0xff]  ;;  %v227_v25 = vld [vmem:[%s1693_s1 + $0xa0] sm:$0xff]  ;;  %vm1070_vm1 = vcmp.ne.s32.totalorder %v85_v33, 0  ;;  %vm1132_vm2 = vcmp.ne.s32.totalorder %v99_v54, 0 }
   0x9   :  { %921 = vmatpush.msra.mxu3 %v235_v7  ;;  %389 = vmatpush.msra.mxu1 %v235_v7  ;;  %v210_v26 = vld [vmem:[%s1693_s1 + $0x18] sm:$0xff]  ;;  %v1042_v29 = vld [vmem:[%s1694_s0 + $0x28] sm:$0xff]  ;;  %v1047_v30 = vld [vmem:[%s1694_s0 + $0x30] sm:$0xff] }
   0xa   :  { %906 = vmatpush.msra.mxu2 %v218_v8  ;;  %337 = vmatpush.msra.mxu0 %v218_v8  ;;  %v226_v28 = vld [vmem:[%s1693_s1 + $0x98] sm:$0xff]  ;;  %v209_v31 = vld [vmem:[%s1693_s1 + $0x10] sm:$0xff]  ;;  %v260_v34 = vrot.slane %v1042_v29, 7  ;;  %v261_v35 = vrot.slane %v1047_v30, 7  ;;  %v208_v36 = vld [vmem:[%s1693_s1 + $0x8] sm:$0xff] }
   0xb   :  { %922 = vmatpush.msra.mxu3 %v234_v9  ;;  %390 = vmatpush.msra.mxu1 %v234_v9  ;;  %v225_v32 = vld [vmem:[%s1693_s1 + $0x90] sm:$0xff]  ;;  %v224_v37 = vld [vmem:[%s1693_s1 + $0x88] sm:$0xff]  ;;  %v207_v38 = vld [vmem:[%s1693_s1] sm:$0xff] }
   0xc   :  { %907 = vmatpush.msra.mxu2 %v217_v10  ;;  %338 = vmatpush.msra.mxu0 %v217_v10  ;;  %v223_v39 = vld [vmem:[%s1693_s1 + $0x80] sm:$0xff]  ;;  %v273_v41 = vsel %vm267_vm0, %v260_v34, %v261_v35  ;;  %v254_v42 = vld [vmem:[%s1693_s1 + $0x178] sm:$0xff]  ;;  %v253_v44 = vld [vmem:[%s1693_s1 + $0x170] sm:$0xff]  ;;  %v37_v10 = vadd.s32 80, %v1018_v21 }
   0xd   :  { %923 = vmatpush.msra.mxu3 %v233_v11  ;;  %391 = vmatpush.msra.mxu1 %v233_v11  ;;  %v1084_v43 = vld [vmem:[%s1694_s0 + $0x38] sm:$0xff]  ;;  %v252_v46 = vld [vmem:[%s1693_s1 + $0x168] sm:$0xff]  ;;  %v251_v47 = vld [vmem:[%s1693_s1 + $0x160] sm:$0xff] }
   0xe   :  { %908 = vmatpush.msra.mxu2 %v216_v12  ;;  %339 = vmatpush.msra.mxu0 %v216_v12  ;;  %v262_v45 = vrot.slane %v1084_v43, 7  ;;  %v250_v50 = vld [vmem:[%s1693_s1 + $0x158] sm:$0xff]  ;;  %v1108_v51 = vld [vmem:[%s1694_s0 + $0x40] sm:$0xff]  ;;  %v249_v52 = vld [vmem:[%s1693_s1 + $0x150] sm:$0xff]  ;;  %v113_v16 = vand.u32 15, %v37_v10  ;;  %v34_v10 = vadd.s32 56, %v1018_v21 }
   0xf   :  { %924 = vmatpush.msra.mxu3 %v232_v13  ;;  %392 = vmatpush.msra.mxu1 %v232_v13  ;;  %v1117_v53 = vld [vmem:[%s1694_s0] sm:$0xff]  ;;  %v263_v55 = vrot.slane %v1108_v51, 7  ;;  %v248_v56 = vld [vmem:[%s1693_s1 + $0x148] sm:$0xff]  ;;  %v1130_v58 = vld [vmem:[%s1694_s0 + $0x58] sm:$0xff] }
  0x10   :  { %909 = vmatpush.msra.mxu2 %v215_v14  ;;  %340 = vmatpush.msra.mxu0 %v215_v14  ;;  %v272_v48 = vsel %vm267_vm0, %v261_v35, %v262_v45  ;;  %v247_v57 = vld [vmem:[%s1693_s1 + $0x140] sm:$0xff]  ;;  %v1141_v61 = vld [vmem:[%s1694_s0 + $0x48] sm:$0xff]  ;;  %v246_v62 = vld [vmem:[%s1693_s1 + $0x138] sm:$0xff]  ;;  %v266_v63 = vrot.slane %v1130_v58, 7  ;;  %v255_v1 = vrot.slane %v1117_v53, 7  ;;  %vm1207_vm4 = vcmp.ne.s32.totalorder %v113_v16, 0 }
  0x11   :  { %925 = vmatpush.msra.mxu3 %v231_v15  ;;  %393 = vmatpush.msra.mxu1 %v231_v15  ;;  %v271_v60 = vsel %vm267_vm0, %v262_v45, %v263_v55  ;;  %v245_v2 = vld [vmem:[%s1693_s1 + $0x130] sm:$0xff]  ;;  %v1158_v3 = vld [vmem:[%s1694_s0 + $0x8] sm:$0xff]  ;;  %v264_v4 = vrot.slane %v1141_v61, 7  ;;  %v243_v8 = vld [vmem:[%s1693_s1 + $0x120] sm:$0xff]  ;;  %v301_v16 = vrot.slane %v1141_v61, 1 }
  0x12   :  { %910 = vmatpush.msra.mxu2 %v214_v17  ;;  %341 = vmatpush.msra.mxu0 %v214_v17  ;;  %v279_v6 = vsel %vm267_vm0, %v266_v63, %v255_v1  ;;  %v244_v7 = vld [vmem:[%s1693_s1 + $0x128] sm:$0xff]  ;;  %v1182_v11 = vld [vmem:[%s1694_s0 + $0x50] sm:$0xff]  ;;  %v242_v12 = vld [vmem:[%s1693_s1 + $0x118] sm:$0xff]  ;;  %v256_v13 = vrot.slane %v1158_v3, 7 }
  0x13   :  { %926 = vmatpush.msra.mxu3 %v230_v18  ;;  %394 = vmatpush.msra.mxu1 %v230_v18  ;;  %v270_v9 = vsel %vm267_vm0, %v263_v55, %v264_v4  ;;  %v241_v14 = vld [vmem:[%s1693_s1 + $0x110] sm:$0xff]  ;;  %v265_v17 = vrot.slane %v1182_v11, 7  ;;  %v1221_v27 = vld [vmem:[%s1694_s0 + $0x18] sm:$0xff]  ;;  %v1239_v35 = vld [vmem:[%s1694_s0 + $0x20] sm:$0xff] }
  0x14   :  { %911 = vmatpush.msra.mxu2 %v213_v19  ;;  %342 = vmatpush.msra.mxu0 %v213_v19  ;;  %v1195_v15 = vld [vmem:[%s1694_s0 + $0x10] sm:$0xff]  ;;  %v278_v18 = vsel %vm267_vm0, %v255_v1, %v256_v13  ;;  %v240_v19 = vld [vmem:[%s1693_s1 + $0x108] sm:$0xff]  ;;  %v258_v33 = vrot.slane %v1221_v27, 7  ;;  %v259_v45 = vrot.slane %v1239_v35, 7  ;;  %v295_v55 = vrot.slane %v1221_v27, 1 }
  0x15   :  { %927 = vmatpush.msra.mxu3 %v229_v20  ;;  %395 = vmatpush.msra.mxu1 %v229_v20  ;;  %v239_v20 = vld [vmem:[%s1693_s1 + $0x100] sm:$0xff] }
  0x16   :  { %912 = vmatpush.msra.mxu2 %v212_v22  ;;  %343 = vmatpush.msra.mxu0 %v212_v22  ;;  %v275_v49 = vsel %vm267_vm0, %v258_v33, %v259_v45  ;;  %v274_v54 = vsel %vm267_vm0, %v259_v45, %v260_v34  ;;  %v297_v34 = vrot.slane %v1042_v29, 1  ;;  %v888_v45 = vld [vmem:[%s1693_s1 + $0x2f8] sm:$0xff] }
  0x17   :  { %928 = vmatpush.msra.mxu3 %v228_v23  ;;  %396 = vmatpush.msra.mxu1 %v228_v23  ;;  %v269_v23 = vsel %vm267_vm0, %v264_v4, %v265_v17 }
  0x18   :  { %913 = vmatpush.msra.mxu2 %v211_v24  ;;  %344 = vmatpush.msra.mxu0 %v211_v24  ;;  %v29_v24 = vadd.s32 16, %v1018_v21 }
  0x19   :  { %929 = vmatpush.msra.mxu3 %v227_v25  ;;  %397 = vmatpush.msra.mxu1 %v227_v25 }
  0x1a   :  { %914 = vmatpush.msra.mxu2 %v210_v26  ;;  %345 = vmatpush.msra.mxu0 %v210_v26  ;;  %v57_v25 = vand.u32 15, %v29_v24  ;;  %v257_v26 = vrot.slane %v1195_v15, 7 }
  0x1b   :  { %930 = vmatpush.msra.mxu3 %v226_v28  ;;  %398 = vmatpush.msra.mxu1 %v226_v28 }
  0x1c   :  { %915 = vmatpush.msra.mxu2 %v209_v31  ;;  %346 = vmatpush.msra.mxu0 %v209_v31  ;;  %vm1223_vm5 = vcmp.ne.s32.totalorder %v57_v25, 0  ;;  %v277_v31 = vsel %vm267_vm0, %v256_v13, %v257_v26  ;;  %v872_v25 = vld [vmem:[%s1693_s1 + $0x278] sm:$0xff] }
  0x1d   :  { %931 = vmatpush.msra.mxu3 %v225_v32  ;;  %399 = vmatpush.msra.mxu1 %v225_v32  ;;  %v268_v32 = vsel %vm267_vm0, %v265_v17, %v266_v63  ;;  %v846_v63 = vld [vmem:[%s1693_s1 + $0x1a8] sm:$0xff] }
  0x1e   :  { %916 = vmatpush.msra.mxu2 %v208_v36  ;;  %347 = vmatpush.msra.mxu0 %v208_v36  ;;  %v292_v36 = vrot.slane %v1117_v53, 1 }
  0x1f   :  { %932 = vmatpush.msra.mxu3 %v224_v37  ;;  %400 = vmatpush.msra.mxu1 %v224_v37  ;;  %v293_v37 = vrot.slane %v1158_v3, 1 }
  0x20   :  { %917 = vmatpush.msra.mxu2 %v207_v38  ;;  %348 = vmatpush.msra.mxu0 %v207_v38  ;;  %v276_v38 = vsel %vm267_vm0, %v257_v26, %v258_v33  ;;  %v303_v26 = vrot.slane %v1130_v58, 1 }
  0x21   :  { %933 = vmatpush.msra.mxu3 %v223_v39  ;;  %832 = vmatmul.msk.f32.vlgmr.msra.gmra.mxu2 %vm1070_vm1, %v273_v41  ;;  %v28_v41 = vadd.s32 8, %v1018_v21 }
  0x22   :  { %420 = vmatmul.f32.vlgmr.msra.gmra.mxu3 %v1047_v30  ;;  %439 = vmatpush.msrb.mxu2 %v254_v42  ;;  %v31_v42 = vadd.s32 32, %v1018_v21 }
  0x23   :  { %401 = vmatpush.msra.mxu1 %v223_v39  ;;  %829 = vmatmul.msk.f32.vlgmr.msra.gmra.mxu0 %vm1161_vm3, %v279_v6  ;;  %v315_v39 = vsel %vm304_vm6, %v292_v36, %v293_v37  ;;  %v298_v6 = vrot.slane %v1047_v30, 1  ;;  %v300_v30 = vrot.slane %v1108_v51, 1 }
  0x24   :  { %440 = vmatpush.msrb.mxu2 %v253_v44  ;;  %402 = vmatmul.f32.vlgmr.msra.gmra.mxu1 %v1117_v53  ;;  %v71_v44 = vand.u32 15, %v31_v42  ;;  %v867_v42 = vld [vmem:[%s1693_s1 + $0x250] sm:$0xff] }
  0x25   :  { %v307_v17 = vsel %vm304_vm6, %v300_v30, %v301_v16  ;;  %683 = vmatpush.msrb.mxu0 %v872_v25  ;;  %736 = vmatpush.msrb.mxu1 %v888_v45  ;;  %v875_v25 = vld [vmem:[%s1693_s1 + $0x290] sm:$0xff] }
  0x26   :  { %441 = vmatpush.msrb.mxu2 %v252_v46  ;;  %v50_v46 = vand.u32 15, %v28_v41  ;;  %vm1255_vm7 = vcmp.ne.s32.totalorder %v71_v44, 0 }
  0x28   :  { %442 = vmatpush.msrb.mxu2 %v251_v47  ;;  %v294_v47 = vrot.slane %v1195_v15, 1  ;;  %vm1264_vm8 = vcmp.ne.s32.totalorder %v50_v46, 15  ;;  %v866_v46 = vld [vmem:[%s1693_s1 + $0x248] sm:$0xff] }
  0x29   :  { %370 = vmatmul.f32.gmra.mxu2 %v272_v48 }
  0x2a   :  { %423 = vmatmul.f32.gmra.mxu3 %v1084_v43  ;;  %443 = vmatpush.msrb.mxu2 %v250_v50 }
  0x2b   :  { %352 = vmatmul.f32.gmra.mxu0 %v278_v18  ;;  %v36_v18 = vadd.s32 72, %v1018_v21 }
  0x2c   :  { %444 = vmatpush.msrb.mxu2 %v249_v52  ;;  %405 = vmatmul.f32.gmra.mxu1 %v1158_v3  ;;  %v314_v52 = vsel %vm304_vm6, %v293_v37, %v294_v47  ;;  %v38_v37 = vadd.s32 88, %v1018_v21 }
  0x2e   :  { %445 = vmatpush.msrb.mxu2 %v248_v56  ;;  %v313_v56 = vsel %vm304_vm6, %v294_v47, %v295_v55  ;;  %v120_v41 = vand.u32 15, %v38_v37  ;;  %v1627_v47 = vld [vmem:[%s1695_s2 + $0x1] ss:$0 sm:$0xff] }
  0x30   :  { %446 = vmatpush.msrb.mxu2 %v247_v57  ;;  %v30_v57 = vadd.s32 24, %v1018_v21  ;;  %vm1358_vm13 = vcmp.ne.s32.totalorder %v120_v41, 15 }
  0x31   :  { %833 = vmatmul.msk.f32.gmra.mxu2 %vm1132_vm2, %v271_v60 }
  0x32   :  { %426 = vmatmul.f32.gmra.mxu3 %v1108_v51  ;;  %447 = vmatpush.msrb.mxu2 %v246_v62  ;;  %v64_v60 = vand.u32 15, %v30_v57  ;;  %v296_v62 = vrot.slane %v1239_v35, 1  ;;  %v863_v57 = vld [vmem:[%s1693_s1 + $0x230] sm:$0xff] }
  0x33   :  { %830 = vmatmul.msk.f32.gmra.mxu0 %vm1223_vm5, %v277_v31  ;;  %v871_v31 = vld [vmem:[%s1693_s1 + $0x270] sm:$0xff] }
  0x34   :  { %448 = vmatpush.msrb.mxu2 %v245_v2  ;;  %408 = vmatmul.f32.gmra.mxu1 %v1195_v15  ;;  %vm1281_vm9 = vcmp.ne.s32.totalorder %v64_v60, 15  ;;  %v312_v0 = vsel %vm304_vm6, %v295_v55, %v296_v62  ;;  %v311_v1 = vsel %vm304_vm6, %v296_v62, %v297_v34  ;;  %v32_v2 = vadd.s32 40, %v1018_v21  ;;  %v886_v55 = vld [vmem:[%s1693_s1 + $0x2e8] sm:$0xff]  ;;  %v884_v62 = vld [vmem:[%s1693_s1 + $0x2d8] sm:$0xff] }
  0x35   :  { %684 = vmatpush.msrb.mxu0 %v871_v31  ;;  %v874_v31 = vld [vmem:[%s1693_s1 + $0x288] sm:$0xff] }
  0x36   :  { %449 = vmatpush.msrb.mxu2 %v244_v7  ;;  %v78_v4 = vand.u32 15, %v32_v2  ;;  %v882_v2 = vld [vmem:[%s1693_s1 + $0x2c8] sm:$0xff] }
  0x38   :  { %450 = vmatpush.msrb.mxu2 %v243_v8  ;;  %vm1294_vm10 = vcmp.ne.s32.totalorder %v78_v4, 15  ;;  %v310_v8 = vsel %vm304_vm6, %v297_v34, %v298_v6  ;;  %v883_v34 = vld [vmem:[%s1693_s1 + $0x2d0] sm:$0xff]  ;;  %v860_v4 = vld [vmem:[%s1693_s1 + $0x218] sm:$0xff] }
  0x39   :  { %376 = vmatmul.f32.gmra.mxu2 %v270_v9 }
  0x3a   :  { %429 = vmatmul.f32.gmra.mxu3 %v1141_v61  ;;  %451 = vmatpush.msrb.mxu2 %v242_v12  ;;  %v92_v12 = vand.u32 15, %v34_v10  ;;  %v880_v10 = vld [vmem:[%s1693_s1 + $0x2b8] sm:$0xff] }
  0x3b   :  { %358 = vmatmul.f32.gmra.mxu0 %v276_v38  ;;  %v869_v38 = vld [vmem:[%s1693_s1 + $0x260] sm:$0xff] }
  0x3c   :  { %452 = vmatpush.msrb.mxu2 %v241_v14  ;;  %411 = vmatmul.f32.gmra.mxu1 %v1221_v27  ;;  %vm1307_vm11 = vcmp.ne.s32.totalorder %v92_v12, 15 }
  0x3e   :  { %453 = vmatpush.msrb.mxu2 %v240_v19  ;;  %v106_v19 = vand.u32 15, %v36_v18  ;;  %v877_v18 = vld [vmem:[%s1693_s1 + $0x2a0] sm:$0xff] }
  0x40   :  { %454 = vmatpush.msrb.mxu2 %v239_v20  ;;  %v302_v20 = vrot.slane %v1182_v11, 1  ;;  %vm1320_vm12 = vcmp.ne.s32.totalorder %v106_v19, 15 }
  0x41   :  { %834 = vmatmul.msk.f32.gmra.mxu2 %vm1207_vm4, %v269_v23 }
  0x42   :  { %432 = vmatmul.f32.gmra.mxu3 %v1182_v11  ;;  %v306_v24 = vsel %vm304_vm6, %v301_v16, %v302_v20  ;;  %v305_v33 = vsel %vm304_vm6, %v302_v20, %v303_v26  ;;  %v857_v16 = vld [vmem:[%s1693_s1 + $0x200] sm:$0xff]  ;;  %v876_v20 = vld [vmem:[%s1693_s1 + $0x298] sm:$0xff] }
  0x43   :  { %831 = vmatmul.msk.f32.gmra.mxu0 %vm1255_vm7, %v275_v49  ;;  %v316_v49 = vsel %vm304_vm6, %v303_v26, %v292_v36  ;;  %v885_v36 = vld [vmem:[%s1693_s1 + $0x2e0] sm:$0xff] }
  0x44   :  { %414 = vmatmul.f32.gmra.mxu1 %v1239_v35 }
  0x49   :  { %382 = vmatmul.f32.gmra.mxu2 %v268_v32  ;;  %v870_v32 = vld [vmem:[%s1693_s1 + $0x268] sm:$0xff] }
  0x4a   :  { %435 = vmatmul.f32.gmra.mxu3 %v1130_v58  ;;  %685 = vmatpush.msrb.mxu0 %v870_v32  ;;  %v873_v32 = vld [vmem:[%s1693_s1 + $0x280] sm:$0xff] }
  0x4b   :  { %364 = vmatmul.f32.gmra.mxu0 %v274_v54  ;;  %v865_v54 = vld [vmem:[%s1693_s1 + $0x240] sm:$0xff] }
  0x4c   :  { %417 = vmatmul.f32.gmra.mxu1 %v1042_v29  ;;  %v299_v29 = vrot.slane %v1084_v43, 1  ;;  %686 = vmatpush.msrb.mxu0 %v869_v38 }
  0x4e   :  { %v309_v9 = vsel %vm304_vm6, %v298_v6, %v299_v29  ;;  %v308_v14 = vsel %vm304_vm6, %v299_v29, %v300_v30  ;;  %v881_v6 = vld [vmem:[%s1693_s1 + $0x2c0] sm:$0xff]  ;;  %v859_v29 = vld [vmem:[%s1693_s1 + $0x210] sm:$0xff]  ;;  %v858_v30 = vld [vmem:[%s1693_s1 + $0x208] sm:$0xff] }
  0x51   :  { %455 = vmatmul.f32.vlgmr.msrb.gmra.mxu2 %v315_v39  ;;  %v868_v39 = vld [vmem:[%s1693_s1 + $0x258] sm:$0xff] }
  0x52   :  { %687 = vmatpush.msrb.mxu0 %v868_v39 }
  0x54   :  { %688 = vmatpush.msrb.mxu0 %v867_v42 }
  0x56   :  { %689 = vmatpush.msrb.mxu0 %v866_v46 }
  0x58   :  { %690 = vmatpush.msrb.mxu0 %v865_v54 }
  0x59   :  { %835 = vmatmul.msk.f32.gmra.mxu2 %vm1264_vm8, %v314_v52  ;;  %v887_v52 = vld [vmem:[%s1693_s1 + $0x2f0] sm:$0xff] }
  0x5a   :  { %737 = vmatpush.msrb.mxu1 %v887_v52 }
  0x5c   :  { %738 = vmatpush.msrb.mxu1 %v886_v55 }
  0x5e   :  { %739 = vmatpush.msrb.mxu1 %v885_v36 }
  0x60   :  { %740 = vmatpush.msrb.mxu1 %v884_v62 }
  0x61   :  { %461 = vmatmul.f32.gmra.mxu2 %v313_v56  ;;  %v864_v56 = vld [vmem:[%s1693_s1 + $0x238] sm:$0xff] }
  0x62   :  { %691 = vmatpush.msrb.mxu0 %v864_v56  ;;  %741 = vmatpush.msrb.mxu1 %v883_v34 }
  0x64   :  { %692 = vmatpush.msrb.mxu0 %v863_v57  ;;  %742 = vmatpush.msrb.mxu1 %v882_v2 }
  0x66   :  { %743 = vmatpush.msrb.mxu1 %v881_v6 }
  0x68   :  { %744 = vmatpush.msrb.mxu1 %v880_v10 }
  0x69   :  { %836 = vmatmul.msk.f32.gmra.mxu2 %vm1281_vm9, %v312_v0  ;;  %v862_v0 = vld [vmem:[%s1693_s1 + $0x228] sm:$0xff] }
  0x6a   :  { %693 = vmatpush.msrb.mxu0 %v862_v0 }
  0x71   :  { %467 = vmatmul.f32.gmra.mxu2 %v311_v1  ;;  %v861_v1 = vld [vmem:[%s1693_s1 + $0x220] sm:$0xff] }
  0x72   :  { %694 = vmatpush.msrb.mxu0 %v861_v1 }
  0x74   :  { %695 = vmatpush.msrb.mxu0 %v860_v4 }
  0x76   :  { %696 = vmatpush.msrb.mxu0 %v859_v29 }
  0x78   :  { %697 = vmatpush.msrb.mxu0 %v858_v30 }
  0x79   :  { %837 = vmatmul.msk.f32.gmra.mxu2 %vm1294_vm10, %v310_v8  ;;  %v1412_v8 = vld [vmem:[%s1695_s2] ss:$0 sm:$0xff] }
  0x7a   :  { %698 = vmatpush.msrb.mxu0 %v857_v16 }
  0x81   :  { %473 = vmatmul.f32.gmra.mxu2 %v309_v9 }
  0x89   :  { %838 = vmatmul.msk.f32.gmra.mxu2 %vm1307_vm11, %v308_v14  ;;  %v879_v14 = vld [vmem:[%s1693_s1 + $0x2b0] sm:$0xff] }
  0x8a   :  { %745 = vmatpush.msrb.mxu1 %v879_v14 }
  0x91   :  { %479 = vmatmul.f32.gmra.mxu2 %v307_v17  ;;  %v878_v17 = vld [vmem:[%s1693_s1 + $0x2a8] sm:$0xff] }
  0x92   :  { %746 = vmatpush.msrb.mxu1 %v878_v17 }
  0x94   :  { %747 = vmatpush.msrb.mxu1 %v877_v18 }
  0x96   :  { %748 = vmatpush.msrb.mxu1 %v876_v20 }
  0x98   :  { %749 = vmatpush.msrb.mxu1 %v875_v25 }
  0x99   :  { %839 = vmatmul.msk.f32.gmra.mxu2 %vm1320_vm12, %v306_v24 }
  0x9a   :  { %750 = vmatpush.msrb.mxu1 %v874_v31 }
  0x9c   :  { %751 = vmatpush.msrb.mxu1 %v873_v32 }
  0xa0   :  { %v350_v26 = vpop.f32.mrf.mxu0 }
  0xa1   :  { %485 = vmatmul.f32.gmra.mxu2 %v305_v33  ;;  %v403_v37 = vpop.f32.mrf.mxu1  ;;  %v351_v45 = vadd.f32 %v1412_v8, %v350_v26 }
  0xa4   :  { %v1350_v44 = vpop.f32.mrf.mxu2 }
  0xa8   :  { %v353_v39 = vpop.f32.mrf.mxu0 }
  0xa9   :  { %840 = vmatmul.msk.f32.gmra.mxu2 %vm1358_vm13, %v316_v49  ;;  %v406_v46 = vpop.f32.mrf.mxu1  ;;  %v404_v49 = vadd.f32 %v403_v37, %v351_v45  ;;  %v354_v56 = vadd.f32 %v1412_v8, %v353_v39  ;;  %v856_v37 = vld [vmem:[%s1693_s1 + $0x1f8] sm:$0xff]  ;;  %v855_v39 = vld [vmem:[%s1693_s1 + $0x1f0] sm:$0xff]  ;;  %v854_v45 = vld [vmem:[%s1693_s1 + $0x1e8] sm:$0xff] }
  0xaa   :  { %630 = vmatpush.msrb.mxu3 %v856_v37 }
  0xab   :  { %v407_v62 = vadd.f32 %v406_v46, %v354_v56 }
  0xac   :  { %v1386_v60 = vpop.f32.mrf.mxu2  ;;  %631 = vmatpush.msrb.mxu3 %v855_v39 }
  0xae   :  { %632 = vmatpush.msrb.mxu3 %v854_v45  ;;  %v369_v45 = vadd.f32 %v1412_v8, %v1350_v44 }
  0xb0   :  { %v356_v54 = vpop.f32.mrf.mxu0 }
  0xb1   :  { %v409_v57 = vpop.f32.mrf.mxu1  ;;  %v357_v34 = vadd.f32 %v1412_v8, %v356_v54 }
  0xb3   :  { %v410_v6 = vadd.f32 %v409_v57, %v357_v34  ;;  %v853_v57 = vld [vmem:[%s1693_s1 + $0x1e0] sm:$0xff]  ;;  %v851_v34 = vld [vmem:[%s1693_s1 + $0x1d0] sm:$0xff] }
  0xb4   :  { %v374_v9 = vpop.f32.mrf.mxu2  ;;  %633 = vmatpush.msrb.mxu3 %v853_v57 }
  0xb5   :  { %v1421_v12 = vadd.f32 %v1412_v8, %v374_v9 }
  0xb8   :  { %v359_v2 = vpop.f32.mrf.mxu0 }
  0xb9   :  { %v412_v14 = vpop.f32.mrf.mxu1  ;;  %v360_v20 = vadd.f32 %v1412_v8, %v359_v2 }
  0xbc   :  { %v377_v19 = vpop.f32.mrf.mxu2 }
  0xbd   :  { %v1442_v24 = vadd.f32 %v1412_v8, %v377_v19 }
  0xc0   :  { %v362_v26 = vpop.f32.mrf.mxu0 }
  0xc4   :  { %v380_v33 = vpop.f32.mrf.mxu2 }
  0xc5   :  { %v1454_v38 = vadd.f32 %v1412_v8, %v380_v33  ;;  %v413_v33 = vadd.f32 %v412_v14, %v360_v20 }
  0xc8   :  { %v365_v2 = vpop.f32.mrf.mxu0 }
  0xc9   :  { %v366_v14 = vadd.f32 %v1412_v8, %v365_v2 }
  0xcc   :  { %v383_v41 = vpop.f32.mrf.mxu2 }
  0xcd   :  { %v1457_v42 = vadd.f32 %v1412_v8, %v383_v41 }
  0xd4   :  { %v456_v52 = vpop.f32.mrf.mxu2 }
  0xd5   :  { %v457_v55 = vadd.f32 %v456_v52, %v404_v49  ;;  %v415_v52 = vpop.f32.mrf.mxu1 }
  0xd7   :  { %v1461_v36 = vmax.f32 %v457_v55, 0.0  ;;  %v363_v55 = vadd.f32 %v1412_v8, %v362_v26 }
  0xd9   :  { %699 = vmatmul.f32.vlgmr.msrb.gmra.mxu0 %v1461_v36  ;;  %v553_v29 = vrot.slane %v1461_v36, 7  ;;  %v589_v9 = vrot.slane %v1461_v36, 1 }
  0xdc   :  { %v459_v0 = vpop.f32.mrf.mxu2 }
  0xdd   :  { %v460_v1 = vadd.f32 %v459_v0, %v407_v62  ;;  %v852_v62 = vld [vmem:[%s1693_s1 + $0x1d8] sm:$0xff]  ;;  %v416_v0 = vadd.f32 %v415_v52, %v363_v55 }
  0xde   :  { %634 = vmatpush.msrb.mxu3 %v852_v62  ;;  %v848_v52 = vld [vmem:[%s1693_s1 + $0x1b8] sm:$0xff] }
  0xdf   :  { %v493_v4 = vmax.f32 %v460_v1, 0.0 }
  0xe0   :  { %635 = vmatpush.msrb.mxu3 %v851_v34 }
  0xe1   :  { %v590_v10 = vrot.slane %v493_v4, 1  ;;  %702 = vmatmul.f32.gmra.mxu0 %v493_v4  ;;  %v554_v30 = vrot.slane %v493_v4, 7 }
  0xe3   :  { %v611_v16 = vsel %vm304_vm6, %v589_v9, %v590_v10  ;;  %v1475_v17 = vsel %vm267_vm0, %v553_v29, %v554_v30 }
  0xe4   :  { %v462_v18 = vpop.f32.mrf.mxu2  ;;  %752 = vmatmul.f32.vlgmr.msrb.gmra.mxu1 %v611_v16  ;;  %v421_v16 = vpop.f32.mrf.mxu3 }
  0xe5   :  { %v463_v19 = vadd.f32 %v462_v18, %v410_v6  ;;  %v418_v18 = vpop.f32.mrf.mxu1  ;;  %v422_v44 = vadd.f32 %v421_v16, %v369_v45 }
  0xe6   :  { %v419_v26 = vadd.f32 %v418_v18, %v366_v14  ;;  %v844_v14 = vld [vmem:[%s1693_s1 + $0x198] sm:$0xff] }
  0xe7   :  { %v494_v25 = vmax.f32 %v463_v19, 0.0 }
  0xe9   :  { %v555_v31 = vrot.slane %v494_v25, 7  ;;  %v591_v32 = vrot.slane %v494_v25, 1  ;;  %705 = vmatmul.f32.gmra.mxu0 %v494_v25 }
  0xeb   :  { %v610_v41 = vsel %vm304_vm6, %v590_v10, %v591_v32  ;;  %v1491_v46 = vsel %vm267_vm0, %v554_v30, %v555_v31 }
  0xec   :  { %v465_v49 = vpop.f32.mrf.mxu2  ;;  %896 = vmatmul.msk.f32.gmra.mxu1 %vm1264_vm8, %v610_v41  ;;  %v424_v55 = vpop.f32.mrf.mxu3 }
  0xed   :  { %v466_v54 = vadd.f32 %v465_v49, %v413_v33 }
  0xef   :  { %v495_v56 = vmax.f32 %v466_v54, 0.0  ;;  %v847_v54 = vld [vmem:[%s1693_s1 + $0x1b0] sm:$0xff] }
  0xf1   :  { %708 = vmatmul.f32.gmra.mxu0 %v495_v56  ;;  %v592_v50 = vrot.slane %v495_v56, 1  ;;  %v556_v1 = vrot.slane %v495_v56, 7 }
  0xf3   :  { %v609_v4 = vsel %vm304_vm6, %v591_v32, %v592_v50  ;;  %v1509_v6 = vsel %vm267_vm0, %v555_v31, %v556_v1  ;;  %v850_v32 = vld [vmem:[%s1693_s1 + $0x1c8] sm:$0xff]  ;;  %v849_v31 = vld [vmem:[%s1693_s1 + $0x1c0] sm:$0xff] }
  0xf4   :  { %v468_v10 = vpop.f32.mrf.mxu2  ;;  %758 = vmatmul.f32.gmra.mxu1 %v609_v4  ;;  %636 = vmatpush.msrb.mxu3 %v850_v32  ;;  %v427_v16 = vpop.f32.mrf.mxu3  ;;  %v842_v32 = vld [vmem:[%s1693_s1 + $0x188] sm:$0xff] }
  0xf5   :  { %v469_v30 = vadd.f32 %v468_v10, %v416_v0 }
  0xf6   :  { %637 = vmatpush.msrb.mxu3 %v849_v31 }
  0xf7   :  { %v496_v19 = vmax.f32 %v469_v30, 0.0  ;;  %v845_v30 = vld [vmem:[%s1693_s1 + $0x1a0] sm:$0xff] }
  0xf8   :  { %638 = vmatpush.msrb.mxu3 %v848_v52 }
  0xf9   :  { %v557_v20 = vrot.slane %v496_v19, 7  ;;  %v593_v25 = vrot.slane %v496_v19, 1  ;;  %711 = vmatmul.f32.gmra.mxu0 %v496_v19 }
  0xfa   :  { %639 = vmatpush.msrb.mxu3 %v847_v54 }
  0xfb   :  { %v608_v33 = vsel %vm304_vm6, %v592_v50, %v593_v25  ;;  %v1522_v37 = vsel %vm267_vm0, %v556_v1, %v557_v20  ;;  %v372_v1 = vadd.f32 %v1412_v8, %v1386_v60  ;;  %v843_v60 = vld [vmem:[%s1693_s1 + $0x190] sm:$0xff] }
  0xfc   :  { %v471_v39 = vpop.f32.mrf.mxu2  ;;  %897 = vmatmul.msk.f32.gmra.mxu1 %vm1281_vm9, %v608_v33  ;;  %640 = vmatpush.msrb.mxu3 %v846_v63  ;;  %v841_v33 = vld [vmem:[%s1693_s1 + $0x180] sm:$0xff] }
  0xfd   :  { %v472_v41 = vadd.f32 %v471_v39, %v419_v26  ;;  %v425_v18 = vadd.f32 %v424_v55, %v372_v1 }
  0xfe   :  { %641 = vmatpush.msrb.mxu3 %v845_v30 }
  0xff   :  { %v497_v49 = vmax.f32 %v472_v41, 0.0  ;;  %v428_v41 = vadd.f32 %v427_v16, %v1421_v12 }
 0x100   :  { %642 = vmatpush.msrb.mxu3 %v844_v14 }
 0x101   :  { %714 = vmatmul.f32.gmra.mxu0 %v497_v49  ;;  %v594_v56 = vrot.slane %v497_v49, 1  ;;  %v558_v57 = vrot.slane %v497_v49, 7  ;;  %v430_v49 = vpop.f32.mrf.mxu3 }
 0x102   :  { %643 = vmatpush.msrb.mxu3 %v843_v60 }
 0x103   :  { %v607_v62 = vsel %vm304_vm6, %v593_v25, %v594_v56  ;;  %v1541_v0 = vsel %vm267_vm0, %v557_v20, %v558_v57 }
 0x104   :  { %v474_v50 = vpop.f32.mrf.mxu2  ;;  %764 = vmatmul.f32.gmra.mxu1 %v607_v62  ;;  %644 = vmatpush.msrb.mxu3 %v842_v32 }
 0x105   :  { %v475_v34 = vadd.f32 %v474_v50, %v422_v44 }
 0x106   :  { %645 = vmatpush.msrb.mxu3 %v841_v33 }
 0x107   :  { %v498_v2 = vmax.f32 %v475_v34, 0.0 }
 0x109   :  { %v559_v4 = vrot.slane %v498_v2, 7  ;;  %v595_v10 = vrot.slane %v498_v2, 1  ;;  %717 = vmatmul.f32.gmra.mxu0 %v498_v2  ;;  %v433_v34 = vpop.f32.mrf.mxu3 }
 0x10b   :  { %v606_v19 = vsel %vm304_vm6, %v594_v56, %v595_v10  ;;  %v1558_v8 = vsel %vm267_vm0, %v558_v57, %v559_v4  ;;  %v431_v57 = vadd.f32 %v430_v49, %v1442_v24 }
 0x10c   :  { %v477_v20 = vpop.f32.mrf.mxu2  ;;  %898 = vmatmul.msk.f32.gmra.mxu1 %vm1294_vm10, %v606_v19 }
 0x10d   :  { %v478_v25 = vadd.f32 %v477_v20, %v425_v18 }
 0x10f   :  { %v499_v26 = vmax.f32 %v478_v25, 0.0 }
 0x111   :  { %720 = vmatmul.f32.gmra.mxu0 %v499_v26  ;;  %v596_v31 = vrot.slane %v499_v26, 1  ;;  %v560_v39 = vrot.slane %v499_v26, 7  ;;  %v436_v13 = vpop.f32.mrf.mxu3 }
 0x112   :  { %v437_v20 = vadd.f32 %v436_v13, %v1457_v42 }
 0x113   :  { %v605_v7 = vsel %vm304_vm6, %v595_v10, %v596_v31  ;;  %v569_v45 = vsel %vm267_vm0, %v559_v4, %v560_v39  ;;  %v434_v10 = vadd.f32 %v433_v34, %v1454_v38 }
 0x114   :  { %v480_v52 = vpop.f32.mrf.mxu2  ;;  %770 = vmatmul.f32.gmra.mxu1 %v605_v7 }
 0x115   :  { %v481_v54 = vadd.f32 %v480_v52, %v428_v41 }
 0x117   :  { %v500_v55 = vmax.f32 %v481_v54, 0.0 }
 0x119   :  { %v561_v56 = vrot.slane %v500_v55, 7  ;;  %v597_v63 = vrot.slane %v500_v55, 1  ;;  %723 = vmatmul.f32.gmra.mxu0 %v500_v55 }
 0x11b   :  { %v604_v12 = vsel %vm304_vm6, %v596_v31, %v597_v63  ;;  %v568_v44 = vsel %vm267_vm0, %v560_v39, %v561_v56 }
 0x11c   :  { %v483_v62 = vpop.f32.mrf.mxu2  ;;  %899 = vmatmul.msk.f32.gmra.mxu1 %vm1307_vm11, %v604_v12 }
 0x11d   :  { %v484_v50 = vadd.f32 %v483_v62, %v431_v57 }
 0x11f   :  { %v501_v1 = vmax.f32 %v484_v50, 0.0 }
 0x121   :  { %726 = vmatmul.f32.gmra.mxu0 %v501_v1  ;;  %v598_v2 = vrot.slane %v501_v1, 1  ;;  %v562_v4 = vrot.slane %v501_v1, 7 }
 0x123   :  { %v603_v24 = vsel %vm304_vm6, %v597_v63, %v598_v2  ;;  %v567_v30 = vsel %vm267_vm0, %v561_v56, %v562_v4 }
 0x124   :  { %v486_v14 = vpop.f32.mrf.mxu2  ;;  %776 = vmatmul.f32.gmra.mxu1 %v603_v24 }
 0x125   :  { %v487_v16 = vadd.f32 %v486_v14, %v434_v10 }
 0x127   :  { %v502_v18 = vmax.f32 %v487_v16, 0.0 }
 0x129   :  { %v563_v19 = vrot.slane %v502_v18, 7  ;;  %v599_v60 = vrot.slane %v502_v18, 1  ;;  %729 = vmatmul.f32.gmra.mxu0 %v502_v18 }
 0x12b   :  { %v602_v25 = vsel %vm304_vm6, %v598_v2, %v599_v60  ;;  %v566_v38 = vsel %vm267_vm0, %v562_v4, %v563_v19 }
 0x12c   :  { %v489_v26 = vpop.f32.mrf.mxu2  ;;  %900 = vmatmul.msk.f32.gmra.mxu1 %vm1320_vm12, %v602_v25 }
 0x12d   :  { %v490_v32 = vadd.f32 %v489_v26, %v437_v20  ;;  %v936_v26 = vld [vmem:[%s1694_s0 + $0x28] sm:$0xff] }
 0x12f   :  { %v503_v31 = vmax.f32 %v490_v32, 0.0 }
 0x131   :  { %v564_v33 = vrot.slane %v503_v31, 7  ;;  %732 = vmatmul.f32.gmra.mxu0 %v503_v31  ;;  %v600_v39 = vrot.slane %v503_v31, 1 }
 0x133   :  { %v576_v42 = vsel %vm267_vm0, %v564_v33, %v553_v29  ;;  %v601_v41 = vsel %vm304_vm6, %v599_v60, %v600_v39  ;;  %v565_v7 = vsel %vm267_vm0, %v563_v19, %v564_v33  ;;  %v612_v23 = vsel %vm304_vm6, %v600_v39, %v589_v9 }
 0x134   :  { %890 = vmatmul.msk.f32.vlgmr.msrb.gmra.mxu3 %vm1161_vm3, %v576_v42  ;;  %782 = vmatmul.f32.gmra.mxu1 %v601_v41 }
 0x13c   :  { %649 = vmatmul.f32.gmra.mxu3 %v1475_v17  ;;  %901 = vmatmul.msk.f32.gmra.mxu1 %vm1358_vm13, %v612_v23  ;;  %v937_v23 = vld [vmem:[%s1694_s0 + $0x30] sm:$0xff] }
 0x144   :  { %891 = vmatmul.msk.f32.gmra.mxu3 %vm1223_vm5, %v1491_v46 }
 0x14c   :  { %655 = vmatmul.f32.gmra.mxu3 %v1509_v6 }
 0x154   :  { %892 = vmatmul.msk.f32.gmra.mxu3 %vm1255_vm7, %v1522_v37 }
 0x156   :  { %v700_v21 = vpop.f32.mrf.mxu0 }
 0x15c   :  { %661 = vmatmul.f32.gmra.mxu3 %v1541_v0 }
 0x15e   :  { %v703_v28 = vpop.f32.mrf.mxu0 }
 0x161   :  { %v753_v5 = vpop.f32.mrf.mxu1 }
 0x164   :  { %893 = vmatmul.msk.f32.gmra.mxu3 %vm1070_vm1, %v1558_v8 }
 0x166   :  { %v706_v40 = vpop.f32.mrf.mxu0 }
 0x169   :  { %v756_v48 = vpop.f32.mrf.mxu1 }
 0x16c   :  { %667 = vmatmul.f32.gmra.mxu3 %v569_v45 }
 0x16e   :  { %v709_v0 = vpop.f32.mrf.mxu0 }
 0x171   :  { %v759_v59 = vpop.f32.mrf.mxu1 }
 0x174   :  { %894 = vmatmul.msk.f32.gmra.mxu3 %vm1132_vm2, %v568_v44 }
 0x176   :  { %v712_v63 = vpop.f32.mrf.mxu0 }
 0x179   :  { %v762_v45 = vpop.f32.mrf.mxu1 }
 0x17c   :  { %673 = vmatmul.f32.gmra.mxu3 %v567_v30 }
 0x17e   :  { %v715_v2 = vpop.f32.mrf.mxu0 }
 0x181   :  { %v765_v12 = vpop.f32.mrf.mxu1 }
 0x184   :  { %895 = vmatmul.msk.f32.gmra.mxu3 %vm1207_vm4, %v566_v38 }
 0x186   :  { %v718_v13 = vpop.f32.mrf.mxu0 }
 0x189   :  { %v768_v10 = vpop.f32.mrf.mxu1 }
 0x18c   :  { %679 = vmatmul.f32.gmra.mxu3 %v565_v7 }
 0x18e   :  { %v721_v39 = vpop.f32.mrf.mxu0 }
 0x191   :  { %v771_v25 = vpop.f32.mrf.mxu1 }
 0x199   :  { %v774_v41 = vpop.f32.mrf.mxu1 }
 0x1b7   :  { %v647_v36 = vpop.f32.mrf.mxu3 }
 0x1b8   :  { %v648_v29 = vadd.f32 %v1627_v47, %v647_v36  ;;  %v724_v36 = vpop.f32.mrf.mxu0 }
 0x1ba   :  { %v701_v9 = vadd.f32 %v700_v21, %v648_v29 }
 0x1bc   :  { %v754_v17 = vadd.f32 %v753_v5, %v701_v9 }
 0x1be   :  { %v789_v22 = vadd.f32 %v754_v17, %v1117_v53 }
 0x1bf   :  { %v650_v46 = vpop.f32.mrf.mxu3 }
 0x1c0   :  { %v801_v6 = vmax.f32 %v789_v22, 0.0  ;;  %v651_v37 = vadd.f32 %v1627_v47, %v650_v46 }
 0x1c2   :  { %813 = vst [vmem:[%s1696_s3] sm:$0xff] %v801_v6  ;;  %v704_v8 = vadd.f32 %v703_v28, %v651_v37 }
 0x1c4   :  { %v757_v49 = vadd.f32 %v756_v48, %v704_v8 }
 0x1c6   :  { %v790_v52 = vadd.f32 %v757_v49, %v1158_v3 }
 0x1c7   :  { %v653_v54 = vpop.f32.mrf.mxu3 }
 0x1c8   :  { %v802_v55 = vmax.f32 %v790_v52, 0.0  ;;  %v654_v56 = vadd.f32 %v1627_v47, %v653_v54 }
 0x1ca   :  { %814 = vst [vmem:[%s1696_s3 + $0x8] sm:$0xff] %v802_v55  ;;  %v707_v53 = vadd.f32 %v706_v40, %v654_v56 }
 0x1cc   :  { %v760_v57 = vadd.f32 %v759_v59, %v707_v53  ;;  %v777_v59 = vpop.f32.mrf.mxu1 }
 0x1ce   :  { %v791_v44 = vadd.f32 %v760_v57, %v1195_v15 }
 0x1cf   :  { %v656_v62 = vpop.f32.mrf.mxu3 }
 0x1d0   :  { %v803_v50 = vmax.f32 %v791_v44, 0.0  ;;  %v657_v34 = vadd.f32 %v1627_v47, %v656_v62 }
 0x1d2   :  { %815 = vst [vmem:[%s1696_s3 + $0x10] sm:$0xff] %v803_v50  ;;  %v710_v3 = vadd.f32 %v709_v0, %v657_v34  ;;  %v727_v0 = vpop.f32.mrf.mxu0 }
 0x1d4   :  { %v763_v1 = vadd.f32 %v762_v45, %v710_v3  ;;  %v780_v45 = vpop.f32.mrf.mxu1 }
 0x1d6   :  { %v792_v4 = vadd.f32 %v763_v1, %v1221_v27 }
 0x1d7   :  { %v659_v24 = vpop.f32.mrf.mxu3 }
 0x1d8   :  { %v804_v30 = vmax.f32 %v792_v4, 0.0  ;;  %v660_v14 = vadd.f32 %v1627_v47, %v659_v24 }
 0x1da   :  { %816 = vst [vmem:[%s1696_s3 + $0x18] sm:$0xff] %v804_v30  ;;  %v713_v15 = vadd.f32 %v712_v63, %v660_v14  ;;  %v730_v53 = vpop.f32.mrf.mxu0 }
 0x1dc   :  { %v766_v16 = vadd.f32 %v765_v12, %v713_v15  ;;  %v783_v44 = vpop.f32.mrf.mxu1 }
 0x1de   :  { %v793_v18 = vadd.f32 %v766_v16, %v1239_v35 }
 0x1df   :  { %v662_v19 = vpop.f32.mrf.mxu3 }
 0x1e0   :  { %v805_v60 = vmax.f32 %v793_v18, 0.0  ;;  %v663_v20 = vadd.f32 %v1627_v47, %v662_v19 }
 0x1e2   :  { %817 = vst [vmem:[%s1696_s3 + $0x20] sm:$0xff] %v805_v60  ;;  %v716_v27 = vadd.f32 %v715_v2, %v663_v20  ;;  %v733_v2 = vpop.f32.mrf.mxu0 }
 0x1e4   :  { %v769_v38 = vadd.f32 %v768_v10, %v716_v27  ;;  %v786_v4 = vpop.f32.mrf.mxu1 }
 0x1e6   :  { %v794_v32 = vadd.f32 %v936_v26, %v769_v38 }
 0x1e7   :  { %v665_v31 = vpop.f32.mrf.mxu3 }
 0x1e8   :  { %v806_v33 = vmax.f32 %v794_v32, 0.0  ;;  %v666_v35 = vadd.f32 %v1627_v47, %v665_v31 }
 0x1ea   :  { %818 = vst [vmem:[%s1696_s3 + $0x28] sm:$0xff] %v806_v33  ;;  %v719_v42 = vadd.f32 %v718_v13, %v666_v35 }
 0x1ec   :  { %v772_v7 = vadd.f32 %v771_v25, %v719_v42 }
 0x1ee   :  { %v795_v21 = vadd.f32 %v937_v23, %v772_v7 }
 0x1ef   :  { %v668_v5 = vpop.f32.mrf.mxu3 }
 0x1f0   :  { %v807_v28 = vmax.f32 %v795_v21, 0.0  ;;  %v669_v48 = vadd.f32 %v1627_v47, %v668_v5 }
 0x1f2   :  { %819 = vst [vmem:[%s1696_s3 + $0x30] sm:$0xff] %v807_v28  ;;  %v722_v40 = vadd.f32 %v721_v39, %v669_v48 }
 0x1f4   :  { %v775_v29 = vadd.f32 %v774_v41, %v722_v40 }
 0x1f6   :  { %v796_v9 = vadd.f32 %v775_v29, %v1084_v43 }
 0x1f7   :  { %v671_v17 = vpop.f32.mrf.mxu3 }
 0x1f8   :  { %v808_v22 = vmax.f32 %v796_v9, 0.0  ;;  %v672_v46 = vadd.f32 %v1627_v47, %v671_v17 }
 0x1fa   :  { %820 = vst [vmem:[%s1696_s3 + $0x38] sm:$0xff] %v808_v22  ;;  %v725_v6 = vadd.f32 %v724_v36, %v672_v46 }
 0x1fc   :  { %v778_v37 = vadd.f32 %v777_v59, %v725_v6 }
 0x1fe   :  { %v797_v8 = vadd.f32 %v778_v37, %v1108_v51 }
 0x1ff   :  { %v674_v49 = vpop.f32.mrf.mxu3 }
 0x200   :  { %v809_v52 = vmax.f32 %v797_v8, 0.0  ;;  %v675_v54 = vadd.f32 %v1627_v47, %v674_v49 }
 0x202   :  { %821 = vst [vmem:[%s1696_s3 + $0x40] sm:$0xff] %v809_v52  ;;  %v728_v43 = vadd.f32 %v727_v0, %v675_v54 }
 0x204   :  { %v781_v55 = vadd.f32 %v780_v45, %v728_v43 }
 0x206   :  { %v798_v56 = vadd.f32 %v781_v55, %v1141_v61 }
 0x207   :  { %v677_v63 = vpop.f32.mrf.mxu3 }
 0x208   :  { %v810_v57 = vmax.f32 %v798_v56, 0.0  ;;  %v678_v12 = vadd.f32 %v1627_v47, %v677_v63 }
 0x20a   :  { %822 = vst [vmem:[%s1696_s3 + $0x48] sm:$0xff] %v810_v57  ;;  %v731_v51 = vadd.f32 %v730_v53, %v678_v12 }
 0x20c   :  { %v784_v62 = vadd.f32 %v783_v44, %v731_v51 }
 0x20e   :  { %v799_v50 = vadd.f32 %v784_v62, %v1182_v11 }
 0x20f   :  { %v680_v34 = vpop.f32.mrf.mxu3 }
 0x210   :  { %v811_v3 = vmax.f32 %v799_v50, 0.0  ;;  %v681_v1 = vadd.f32 %v1627_v47, %v680_v34 }
 0x212   :  { %823 = vst [vmem:[%s1696_s3 + $0x50] sm:$0xff] %v811_v3  ;;  %v734_v61 = vadd.f32 %v733_v2, %v681_v1 }
 0x214   :  { %v787_v10 = vadd.f32 %v786_v4, %v734_v61 }
 0x216   :  { %v800_v24 = vadd.f32 %v787_v10, %v1130_v58 }
 0x218   :  { %v812_v30 = vmax.f32 %v800_v24, 0.0 }
 0x21a   :  { %824 = vst [vmem:[%s1696_s3 + $0x58] sm:$0xff] %v812_v30 }

</bundles_post_ra>
